<compile_context>
chip_gen: v6e
topology: v6e:2x2x1
jax: 0.10.0
libtpu: 0.0.40
codegen_flags: <defaults>
</compile_context>

<pallas_src>
import functools

import jax
import jax.numpy as jnp
from jax.experimental import pallas as pl
from jax.experimental.pallas import tpu as pltpu


def _round_up(n, m):
    return ((n + m - 1) // m) * m


def _model_kernel(ids_ref,                      # SMEM (B*L,) int32 token ids (scalar prefetch)
                  row_ref,                      # VMEM (1, 1, Dp) gathered glove row for (b, l)
                  w1_ref, b1_ref, w2_ref, b2_ref,  # padded encoder MLP weights (resident)
                  out_ref,                      # VMEM (1, 1, Op) output row for batch b
                  pooled_ref,                   # VMEM (1, Dp) scratch accumulator
                  *, seq_len):
    del ids_ref  # only used by the index_maps (data-dependent gather)
    l = pl.program_id(1)

    # --- per-batch-row accumulator init on the first token ---
    @pl.when(l == 0)
    def _():
        pooled_ref[...] = jnp.zeros_like(pooled_ref)

    # --- sum-pool the gathered embedding row (the DMA did the "gather") ---
    pooled_ref[...] += row_ref[0]                       # (1, Dp) += (1, Dp)

    # --- finalize on the last token: mean pool + tanh MLP encoder ---
    @pl.when(l == pl.num_programs(1) - 1)
    def _():
        pooled = pooled_ref[...] * (1.0 / seq_len)      # (1, Dp) mean over sequence
        h = jnp.tanh(
            jnp.dot(pooled, w1_ref[...], preferred_element_type=jnp.float32) + b1_ref[...]
        )
        y = jnp.dot(h, w2_ref[...], preferred_element_type=jnp.float32) + b2_ref[...]
        out_ref[0] = y.astype(out_ref.dtype)            # (1, Op)


def make_model_forward(table, w1, b1, w2, b2):
    """One-time (init-style) padding of parameters + jitted forward closure."""
    V, D = table.shape
    H = w1.shape[1]
    O = w2.shape[1]

    # Lane/sublane friendly padded sizes (zero padding keeps the math exact).
    Dp = _round_up(D, 128)              # 300 -> 384
    Hp = _round_up(max(H, 128), 128)    # 32  -> 128
    Op = _round_up(max(O, 128), 128)    # 4   -> 128 (lane-dense output)
    Vp = _round_up(V, 8)

    # Hoisted out of the per-call path: built once, reused by every forward.
    table_p = jnp.zeros((Vp, 1, Dp), jnp.float32).at[:V, 0, :D].set(table.astype(jnp.float32))
    w1_p = jnp.zeros((Dp, Hp), jnp.float32).at[:D, :H].set(w1.astype(jnp.float32))
    b1_p = jnp.zeros((1, Hp), jnp.float32).at[:, :H].set(b1.astype(jnp.float32))
    w2_p = jnp.zeros((Hp, Op), jnp.float32).at[:H, :O].set(w2.astype(jnp.float32))
    b2_p = jnp.zeros((1, Op), jnp.float32).at[:, :O].set(b2.astype(jnp.float32))

    @jax.jit
    def forward(x):
        B, L = x.shape

        # Clamp indices so out-of-range tokens can never gather an OOB row.
        ids = jnp.clip(x.astype(jnp.int32), 0, V - 1).reshape(B * L)

        grid_spec = pltpu.PrefetchScalarGridSpec(
            num_scalar_prefetch=1,                              # ids -> SMEM, feeds index_maps
            grid=(B, L),                                        # (batch, token) ; token is reduction
            in_specs=[
                # data-dependent row gather: only B*L glove rows are ever DMA'd
                pl.BlockSpec((1, 1, Dp), lambda b, l, ids: (ids[b * L + l], 0, 0)),
                pl.BlockSpec((Dp, Hp), lambda b, l, ids: (0, 0)),   # W1 (resident)
                pl.BlockSpec((1, Hp), lambda b, l, ids: (0, 0)),    # b1
                pl.BlockSpec((Hp, Op), lambda b, l, ids: (0, 0)),   # W2
                pl.BlockSpec((1, Op), lambda b, l, ids: (0, 0)),    # b2
            ],
            out_specs=pl.BlockSpec((1, 1, Op), lambda b, l, ids: (b, 0, 0)),
            scratch_shapes=[pltpu.VMEM((1, Dp), jnp.float32)],
        )

        out_p = pl.pallas_call(
            functools.partial(_model_kernel, seq_len=L),
            out_shape=jax.ShapeDtypeStruct((B, 1, Op), jnp.float32),
            grid_spec=grid_spec,
            compiler_params=pltpu.CompilerParams(
                # batch rows are independent (v7x 2nd TC); token axis is a reduction
                dimension_semantics=("parallel", "arbitrary"),
            ),
        )(ids, table_p, w1_p, b1_p, w2_p, b2_p)

        return out_p[:, 0, :O]

    return forward


def _reference(x, table, w1, b1, w2, b2):
    emb = jnp.take(table, x, axis=0)              # (B, L, D) == nn.Embedding lookup
    pooled = emb.mean(axis=1)                     # encoder mean pool
    h = jnp.tanh(pooled @ w1 + b1)
    return h @ w2 + b2


if __name__ == "__main__":
    # Small shapes consistent with the module: glove word_dim=300, plus chosen
    # hidden_size / out_size / batch / seq-length.
    ntoken = 50
    V = ntoken + 1          # glove table rows (+1 padding row at index ntoken)
    D = 300                 # word_dim (glove is 300-d)
    H = 32                  # hidden_size
    O = 4                   # out_size
    B, L = 2, 8             # batch, sequence length

    key = jax.random.PRNGKey(0)
    k_tab, k_w1, k_b1, k_w2, k_b2, k_x = jax.random.split(key, 6)

    table = jax.random.normal(k_tab, (V, D), dtype=jnp.float32) * 0.1
    table = table.at[ntoken].set(0.0)             # padding_idx=ntoken row is zero
    w1 = jax.random.normal(k_w1, (D, H), dtype=jnp.float32) * 0.05
    b1 = jax.random.normal(k_b1, (1, H), dtype=jnp.float32) * 0.05
    w2 = jax.random.normal(k_w2, (H, O), dtype=jnp.float32) * 0.05
    b2 = jax.random.normal(k_b2, (1, O), dtype=jnp.float32) * 0.05

    x = jax.random.randint(k_x, (B, L), 0, V, dtype=jnp.int32)

    model_forward = make_model_forward(table, w1, b1, w2, b2)   # pads params once ("init")
    out = model_forward(x)
    out = jax.block_until_ready(out)

    ref = _reference(x, table, w1, b1, w2, b2)
    assert out.shape == (B, O)
    assert jnp.allclose(out, ref, atol=1e-4, rtol=1e-4), "mismatch vs pure-JAX reference"

    print("KERNEL_OK")
</pallas_src>

<mosaic_0001>
module attributes {stable_mosaic.version = 11 : i64} {
  func.func @_model_kernel(%arg0: i32, %arg1: i32, %arg2: memref<16xi32, #tpu.memory_space<smem>>, %arg3: memref<1x1x384xf32, #tpu.memory_space<vmem>>, %arg4: memref<384x128xf32, #tpu.memory_space<vmem>>, %arg5: memref<1x128xf32, #tpu.memory_space<vmem>>, %arg6: memref<128x128xf32, #tpu.memory_space<vmem>>, %arg7: memref<1x128xf32, #tpu.memory_space<vmem>>, %arg8: memref<1x1x128xf32, #tpu.memory_space<vmem>>, %arg9: memref<1x384xf32, #tpu.memory_space<vmem>>) attributes {dimension_semantics = [#tpu.dimension_semantics<parallel>, #tpu.dimension_semantics<arbitrary>], iteration_bounds = array<i64: 2, 8>, scalar_prefetch = 1 : i64, scratch_operands = 1 : i64, tpu.core_type = #tpu.core_type<tc>, window_params = [{transform_indices = @transform_0, window_bounds = array<i64: 1, 1, 384>}, {pipeline_mode = #tpu.pipeline_mode<synchronous>, transform_indices = @transform_1, window_bounds = array<i64: 384, 128>}, {pipeline_mode = #tpu.pipeline_mode<synchronous>, transform_indices = @transform_2, window_bounds = array<i64: 1, 128>}, {pipeline_mode = #tpu.pipeline_mode<synchronous>, transform_indices = @transform_3, window_bounds = array<i64: 128, 128>}, {pipeline_mode = #tpu.pipeline_mode<synchronous>, transform_indices = @transform_4, window_bounds = array<i64: 1, 128>}, {transform_indices = @transform_5, window_bounds = array<i64: 1, 1, 128>}]} {
    %c0_i32 = arith.constant 0 : i32
    %0 = arith.cmpi eq, %arg1, %c0_i32 : i32
    %1 = arith.extui %0 : i1 to i32
    %c0_i32_0 = arith.constant 0 : i32
    %2 = arith.cmpi ne, %1, %c0_i32_0 : i32
    scf.if %2 {
      %cst = arith.constant 0.000000e+00 : f32
      %11 = vector.broadcast %cst : f32 to vector<1x384xf32>
      %c0_8 = arith.constant 0 : index
      %c0_9 = arith.constant 0 : index
      %12 = vector.load %arg9[%c0_8, %c0_9] : memref<1x384xf32, #tpu.memory_space<vmem>>, vector<1x384xf32>
      tpu.vector_store %arg9[%c0_8, %c0_9], %11 {strides = array<i32>} : memref<1x384xf32, #tpu.memory_space<vmem>>, vector<1x384xf32>,
    } else {
    }
    %c0 = arith.constant 0 : index
    %c0_1 = arith.constant 0 : index
    %3 = vector.load %arg9[%c0, %c0_1] : memref<1x384xf32, #tpu.memory_space<vmem>>, vector<1x384xf32>
    %c0_2 = arith.constant 0 : index
    %c0_3 = arith.constant 0 : index
    %c0_4 = arith.constant 0 : index
    %4 = vector.load %arg3[%c0_2, %c0_3, %c0_4] : memref<1x1x384xf32, #tpu.memory_space<vmem>>, vector<1x1x384xf32>
    %5 = vector.shape_cast %4 : vector<1x1x384xf32> to vector<1x384xf32>
    %6 = arith.addf %3, %5 : vector<1x384xf32>
    %c0_5 = arith.constant 0 : index
    %c0_6 = arith.constant 0 : index
    %7 = vector.load %arg9[%c0_5, %c0_6] : memref<1x384xf32, #tpu.memory_space<vmem>>, vector<1x384xf32>
    tpu.vector_store %arg9[%c0_5, %c0_6], %6 {strides = array<i32>} : memref<1x384xf32, #tpu.memory_space<vmem>>, vector<1x384xf32>,
    %c7_i32 = arith.constant 7 : i32
    %8 = arith.cmpi eq, %arg1, %c7_i32 : i32
    %9 = arith.extui %8 : i1 to i32
    %c0_i32_7 = arith.constant 0 : i32
    %10 = arith.cmpi ne, %9, %c0_i32_7 : i32
    scf.if %10 {
      %c0_8 = arith.constant 0 : index
      %c0_9 = arith.constant 0 : index
      %11 = vector.load %arg9[%c0_8, %c0_9] : memref<1x384xf32, #tpu.memory_space<vmem>>, vector<1x384xf32>
      %cst = arith.constant 1.250000e-01 : f32
      %12 = vector.broadcast %cst : f32 to vector<1x384xf32>
      %13 = arith.mulf %11, %12 : vector<1x384xf32>
      %c0_10 = arith.constant 0 : index
      %c0_11 = arith.constant 0 : index
      %14 = vector.load %arg4[%c0_10, %c0_11] : memref<384x128xf32, #tpu.memory_space<vmem>>, vector<384x128xf32>
      %cst_12 = arith.constant dense<0.000000e+00> : vector<1x128xf32>
      %15 = tpu.matmul %13, %14, %cst_12 {dimension_numbers = #tpu.dot_dimension_numbers<[1], [0], [0], [1], [0, 0, 1, 1], [], []>} : vector<1x384xf32>, vector<384x128xf32>, vector<1x128xf32> -> vector<1x128xf32>
      %c0_13 = arith.constant 0 : index
      %c0_14 = arith.constant 0 : index
      %16 = vector.load %arg5[%c0_13, %c0_14] : memref<1x128xf32, #tpu.memory_space<vmem>>, vector<1x128xf32>
      %17 = arith.addf %15, %16 : vector<1x128xf32>
      %18 = math.tanh %17 : vector<1x128xf32>
      %c0_15 = arith.constant 0 : index
      %c0_16 = arith.constant 0 : index
      %19 = vector.load %arg6[%c0_15, %c0_16] : memref<128x128xf32, #tpu.memory_space<vmem>>, vector<128x128xf32>
      %cst_17 = arith.constant dense<0.000000e+00> : vector<1x128xf32>
      %20 = tpu.matmul %18, %19, %cst_17 {dimension_numbers = #tpu.dot_dimension_numbers<[1], [0], [0], [1], [0, 0, 1, 1], [], []>} : vector<1x128xf32>, vector<128x128xf32>, vector<1x128xf32> -> vector<1x128xf32>
      %c0_18 = arith.constant 0 : index
      %c0_19 = arith.constant 0 : index
      %21 = vector.load %arg7[%c0_18, %c0_19] : memref<1x128xf32, #tpu.memory_space<vmem>>, vector<1x128xf32>
      %22 = arith.addf %20, %21 : vector<1x128xf32>
      %c0_20 = arith.constant 0 : index
      %c0_21 = arith.constant 0 : index
      %c0_22 = arith.constant 0 : index
      %23 = vector.load %arg8[%c0_20, %c0_21, %c0_22] : memref<1x1x128xf32, #tpu.memory_space<vmem>>, vector<1x1x128xf32>
      %24 = vector.shape_cast %23 : vector<1x1x128xf32> to vector<1x128xf32>
      %25 = vector.shape_cast %22 : vector<1x128xf32> to vector<1x1x128xf32>
      tpu.vector_store %arg8[%c0_20, %c0_21, %c0_22], %25 {strides = array<i32>} : memref<1x1x128xf32, #tpu.memory_space<vmem>>, vector<1x1x128xf32>,
    } else {
    }
    return
  }
  func.func @transform_0(%arg0: i32, %arg1: i32, %arg2: memref<16xi32, #tpu.memory_space<smem>>) -> (i32, i32, i32) {
    %c8_i32 = arith.constant 8 : i32
    %0 = arith.muli %arg0, %c8_i32 : i32
    %1 = arith.addi %0, %arg1 : i32
    %2 = arith.index_cast %1 : i32 to index
    %3 = memref.load %arg2[%2] : memref<16xi32, #tpu.memory_space<smem>>
    %c0_i32 = arith.constant 0 : i32
    %c0_i32_0 = arith.constant 0 : i32
    %c0_i32_1 = arith.constant 0 : i32
    return %3, %c0_i32, %c0_i32_0 : i32, i32, i32
  }
  func.func @transform_1(%arg0: i32, %arg1: i32, %arg2: memref<16xi32, #tpu.memory_space<smem>>) -> (i32, i32) {
    %c0_i32 = arith.constant 0 : i32
    %c0_i32_0 = arith.constant 0 : i32
    %c0_i32_1 = arith.constant 0 : i32
    return %c0_i32, %c0_i32_0 : i32, i32
  }
  func.func @transform_2(%arg0: i32, %arg1: i32, %arg2: memref<16xi32, #tpu.memory_space<smem>>) -> (i32, i32) {
    %c0_i32 = arith.constant 0 : i32
    %c0_i32_0 = arith.constant 0 : i32
    %c0_i32_1 = arith.constant 0 : i32
    return %c0_i32, %c0_i32_0 : i32, i32
  }
  func.func @transform_3(%arg0: i32, %arg1: i32, %arg2: memref<16xi32, #tpu.memory_space<smem>>) -> (i32, i32) {
    %c0_i32 = arith.constant 0 : i32
    %c0_i32_0 = arith.constant 0 : i32
    %c0_i32_1 = arith.constant 0 : i32
    return %c0_i32, %c0_i32_0 : i32, i32
  }
  func.func @transform_4(%arg0: i32, %arg1: i32, %arg2: memref<16xi32, #tpu.memory_space<smem>>) -> (i32, i32) {
    %c0_i32 = arith.constant 0 : i32
    %c0_i32_0 = arith.constant 0 : i32
    %c0_i32_1 = arith.constant 0 : i32
    return %c0_i32, %c0_i32_0 : i32, i32
  }
  func.func @transform_5(%arg0: i32, %arg1: i32, %arg2: memref<16xi32, #tpu.memory_space<smem>>) -> (i32, i32, i32) {
    %c0_i32 = arith.constant 0 : i32
    %c0_i32_0 = arith.constant 0 : i32
    %c0_i32_1 = arith.constant 0 : i32
    return %arg0, %c0_i32, %c0_i32_0 : i32, i32, i32
  }
}

</mosaic_0001>

<bundles_post_ra>
// kernel: forward.1
= control target key start
LH: loop header
LB: loop body
LE: loop exit
PB: predicated region body
PF: predicated region fallthrough
CT: control target
= control target key end

     0   :  { %s1571_s0 = inlined_call_operand.vmem [shape: s32[16], index: 0, kind: input, shape index: {}]   ;;  %s1572_s1 = inlined_call_operand.hbm [shape: f32[56,1,384], index: 1, kind: input, shape index: {}]   ;;  %s1573_s2 = inlined_call_operand.hbm [shape: f32[384,128], index: 2, kind: input, shape index: {}]   ;;  %s1574_s3 = inlined_call_operand.vmem [shape: f32[1,128], index: 3, kind: input, shape index: {}]   ;;  %s1575_s4 = inlined_call_operand.hbm [shape: f32[128,128], index: 4, kind: input, shape index: {}]   ;;  %s1576_s5 = inlined_call_operand.vmem [shape: f32[1,128], index: 5, kind: input, shape index: {}]   ;;  %s1577_s6 = inlined_call_operand.hbm [shape: f32[2,1,128], index: 6, kind: output, shape index: {}]  }
   0x1   :  { %1592 = sst [smem:[#allocation26_spill]] %s1573_s2  ;;  %s11_s23 = sshll.u32 %s1571_s0, 4  ;;  %s12_s23 = int_to_ptr.vmem [resolvable:$true] %s11_s23 }
   0x2   :  { %1593 = sst [smem:[#allocation27_spill]] %s1575_s4  ;;  %s1021_s24 = scalar_lea.vmem %s12_s23, 16 }
   0x3   :  { %1594 = sst [smem:[#allocation28_spill]] %s1577_s6  ;;  %p1022_p0 = scmp.ne.s32.totalorder %s12_s23, %s1021_s24 }
   0x4   :  { %p1026_p1 = scmp.lt.s32.totalorder %s12_s23, %s12_s23  ;;  %p1027_p2 = scmp.lt.s32.totalorder %s1021_s24, %s1021_s24 }
   0x6   :  { %p1028_p3 = por %p1027_p2, %p1026_p1 }
   0x8   :  { %p1029_p4 = pnand %p1028_p3, %p1022_p0 }
   0xa   :  { %1032 = shalt.err (!%p1029_p4)  }
   0xb   :  { %s1241_s25 = smov [#allocation4]  }
   0xc   :  { %14 = dma.vmem_to_smem %s12_s23, 16, %s1241_s25, [#allocation3] }
   0xd   :  { %1183 = dma.done.wait [#allocation3], 16 }
   0xe   :  { %1184 = vsyncadd [#allocation3], 4294967280 }
   0xf   :  { %16 = sfence }
  0x10   :  { %17 = vsyncpa [#allocation6], 0 }
  0x11   :  { %19 = vsyncpa [#allocation6 + $0x1], 0 }
  0x12   :  { %20 = vsyncpa [#allocation9], 0 }
  0x13   :  { %21 = vsyncpa [#allocation7], 0 }
  0x14   :  { %23 = vsyncpa [#allocation7 + $0x1], 0  ;;  %s1289_s26 = smov 0   ;;  %s1291_s0 = smov 0  }
  0x15   :  { %s1293_s27 = smov 0   ;;  %s1295_s28 = smov 0  }
  0x16   :  { %s1297_s29 = smov 0   ;;  %s1299_s30 = smov 0  }
  0x17   :  { %s1301_s7 = smov 0   ;;  %s1303_s8 = smov 0  }
  0x18   :  { %s1305_s9 = smov 0   ;;  %s1307_s10 = smov 0  }
  0x19   :  { %s1309_s11 = smov 0  }
  0x1a LB: > { %1595 = sst [smem:[#allocation18_spill]] %s1199_s26  ;;  %s726_s12 = sadd.s32 4294967295, %s1239_s11   ;;  %s1239_s11 = sphi %s1309_s11, %s29_s11   ;;  %s1235_s10 = sphi %s1307_s10, %s1628_s10   ;;  %s1231_s9 = sphi %s1305_s9, %s1627_s9   ;;  %s1227_s8 = sphi %s1303_s8, %s1626_s8   ;;  %s1223_s7 = sphi %s1301_s7, %s1625_s7   ;;  %s1219_s30 = sphi %s1299_s30, %s1634_s30   ;;  %s1215_s29 = sphi %s1297_s29, %s1633_s29   ;;  %s1211_s28 = sphi %s1295_s28, %s1632_s28   ;;  %s1207_s27 = sphi %s1293_s27, %s1631_s27   ;;  %s1203_s0 = sphi %s1291_s0, %s1630_s0   ;;  %s1199_s26 = sphi %s1289_s26, %s1629_s26  }
  0x1b   : > { %1596 = sst [smem:[#allocation19_spill]] %s1231_s9  ;;  %s727_s13 = sadd.s32 4294967294, %s1239_s11  }
  0x1c   : > { %1597 = sst [smem:[#allocation20_spill]] %s1235_s10  ;;  %p67_p5 = scmp.ne.s32.totalorder %s1215_s29, %s1211_s28 }
  0x1d   : > { %p1345_p6 = scmp.eq.s32.totalorder %s726_s12, 0  ;;  %p174_p7 = scmp.ne.s32.totalorder %s1207_s27, %s1203_s0 }
  0x1e   : > { %p175_p9 = scmp.eq.s32.totalorder %s726_s12, 15  ;;  %p180_p10 = scmp.ne.s32.totalorder %s1203_s0, %s1199_s26 }
  0x1f   : > { %s1598_s14 = scalar_select %p1345_p6, 1, 0 }
  0x20   : > { %p1353_p8 = por %p1345_p6, %p67_p5  ;;  %p181_p11 = scmp.eq.s32.totalorder %s727_s13, 15 }
  0x21   : > { %p1359_p12 = por %p175_p9, %p174_p7  ;;  %p730_p13 = scmp.ge.s32.totalorder %s1239_s11, 1 }
  0x22   : > { %s1599_s15 = scalar_select %p1353_p8, 1, 0 }
  0x23   : > { %s1600_s16 = scalar_select %p1359_p12, 1, 0 }
  0x24   : > { %p1364_p0 = por %p181_p11, %p180_p10  ;;  %p188_p1 = scmp.lt.s32.totalorder %s1239_s11, 17 }
  0x25   : > { %1601 = sst [smem:[#allocation21_spill]] %s1600_s16  ;;  %s1242_s19 = smov [#allocation8]  }
  0x26   : > { %s1602_s17 = scalar_select %p1364_p0, 1, 0 }
  0x27   : > { %p1369_p2 = pnand %p730_p13, %p188_p1  ;;  %s200_s20 = sshll.u32 %s1242_s19, 4  ;;  %s201_s20 = int_to_ptr.vmem [resolvable:$true] %s200_s20 }
  0x28   : > { %1603 = sst [smem:[#allocation22_spill]] %s1602_s17  ;;  %s1243_s22 = smov [#allocation10]  }
  0x29   : > { %s1604_s18 = scalar_select %p1369_p2, 1, 0 }
  0x2a   : > { %p900_p3 = pneg %p1369_p2  ;;  %s216_s23 = sshll.u32 %s1243_s22, 4  ;;  %s217_s23 = int_to_ptr.vmem [resolvable:$true] %s216_s23 }
  0x2b   : > { %s1044_s24 = scalar_lea.vmem %s201_s20, 6144  ;;  %p1052_p11 = scmp.lt.s32.totalorder %s201_s20, %s201_s20 }
  0x2c   : > { %p1377_p4 = pnand %p900_p3, %p1345_p6  ;;  %p1045_p7 = scmp.ne.s32.totalorder %s201_s20, %s1044_s24 }
  0x2d   : > { %p1053_p13 = scmp.lt.s32.totalorder %s1044_s24, %s1044_s24 }
  0x2e   : > { %p1035_p5 = pneg %p1377_p4 }
  0x2f   : > { %p1054_p1 = por %p1053_p13, %p1052_p11 }
  0x30   : > { %p1047_p9 = pnand %p1045_p7, %p1035_p5 }
  0x32   : > { %p1048_p10 = pneg %p1047_p9 }
  0x34   : > { %p1055_p3 = pnand %p1054_p1, %p1048_p10 }
  0x36   : > { %1058 = shalt.err (!%p1055_p3)
}
  0x37   : > { %s1244_s25 = smov 128   ;;  %s1245_s28 = smov 8  }
  0x38   : > { %s1606_s2 = sld [smem:[#allocation26_spill]]  ;;  %s1070_s19 = scalar_lea.vmem %s217_s23, 2048 }
  0x39   : > { %p1071_p0 = scmp.ne.s32.totalorder %s217_s23, %s1070_s19  ;;  %p1078_p12 = scmp.lt.s32.totalorder %s217_s23, %s217_s23 }
  0x3a   : > { %p1079_p6 = scmp.lt.s32.totalorder %s1070_s19, %s1070_s19 }
  0x3b   : > { %p1073_p7 = pnand %p1071_p0, %p1035_p5 }
  0x3c   : > { %p1080_p11 = por %p1079_p6, %p1078_p12 }
  0x3d   : > { %p1074_p9 = pneg %p1073_p7 }
  0x3e   : > { %903 = dma.hbm_to_vmem [thread:$0]  (!%p1377_p4), %s1606_s2, 6144, %s201_s20, [#allocation9], %s1244_s25, %s1244_s25, %s1245_s28  }
  0x3f   : > { %p1081_p10 = pnand %p1080_p11, %p1074_p9 }
  0x41   : > { %1084 = shalt.err (!%p1081_p10)
}
  0x42   : > { %s1607_s4 = sld [smem:[#allocation27_spill]]  ;;  %s38_s20 = sadd.s32 1, %s1231_s9 }
  0x43   : > { %p39_p6 = scmp.ge.s32.totalorder %s38_s20, 8  ;;  %s41_s12 = sadd.s32 1, %s1235_s10 }
  0x44   : > { %s728_s13 = sshll.u32 %s1235_s10, 3  ;;  %p61_p12 = scmp.ne.s32.totalorder %s1219_s30, %s1215_s29 }
  0x45   : > { %s1636_s20 = smov (%p39_p6, %s38_s20), 0  ;;  %s1638_s12 = smov (!%p39_p6, %s41_s12), %s1235_s10 }
  0x46   : > { %1608 = sst [smem:[#allocation23_spill]] %s1636_s20  ;;  %s46_s21 = sadd.s32 %s1231_s9, %s728_s13 }
  0x47   : > { %p43_p0 = scmp.ge.s32.totalorder %s1638_s12, 2  ;;  %p62_p5 = scmp.eq.s32.totalorder %s1239_s11, 0 }
  0x48   : > { %906 = dma.hbm_to_vmem [thread:$0]  (!%p1377_p4), %s1607_s4, 2048, %s217_s23, [#allocation9], %s1244_s25, %s1244_s25, %s1245_s28  }
  0x49   : > { %s164_s19 = sadd.s32 1, %s1207_s27  ;;  %s47_s22 = sld [smem:[#allocation4 + %s46_s21]] }
  0x4a   : > { %s1640_s12 = smov (%p43_p0, %s1638_s12), 0  ;;  %p1412_p4 = por %p62_p5, %p61_p12 }
  0x4b   : > { %1609 = sst [smem:[#allocation24_spill]] %s1640_s12  ;;  %s233_s25 = sand.u32 1, %s1219_s30  }
  0x4c   : > { %s729_s28 = sshll.u32 %s1640_s12, 3  ;;  %s161_s24 = ssub.s32 %s1235_s10, %s1640_s12 }
  0x4d   : > { %s49_s13 = sadd.s32 %s729_s28, %s1636_s20  ;;  %p162_p13 = scmp.eq.s32.totalorder %s161_s24, 0 }
  0x4e   : > { %s50_s2 = sld [smem:[#allocation4 + %s49_s13]]  ;;  %p919_p1 = scmp.lt.s32.totalorder %s1239_s11, 16 }
  0x4f   : > { %s1423_s4 = scalar_select %p162_p13, %s1207_s27, %s164_s19  }
  0x50   : > { %s54_s9 = sadd.s32 1, %s1219_s30  ;;  %s883_s17 = smul.u32 3, %s233_s25 }
  0x51   : > { %1611 = sst [smem:[#allocation25_spill]] %s1423_s4  ;;  %s1642_s21 = smov (!%p1412_p4, %s46_s21), 0 }
  0x52   : > { %s890_s26 = scalar_select %p1412_p4, [#allocation4], [#allocation12] }
  0x53   : > { %p1432_p3 = pnand %p919_p1, %p1412_p4  ;;  %s1646_s21 = smov (!%p919_p1, %s1642_s21), 0 }
  0x54   : > { %s1644_s26 = smov (!%p919_p1, %s890_s26), [#allocation13]  ;;  %s51_s6 = ssub.s32 %s47_s22, %s50_s2 }
  0x55   : > { %p52_p7 = scmp.eq.s32.totalorder %s51_s6, 0  ;;  %s240_s19 = sld [smem:[%s1644_s26 + %s1646_s21]] }
  0x56   : > { %s237_s24 = scalar_lea.vmem [#allocation5], %s883_s17  ;;  %s234_s2 = scalar_lea.sflag [#allocation6], %s233_s25 }
  0x57   : > { %s1437_s28 = scalar_select %p52_p7, %s1219_s30, %s54_s9  }
  0x58   : > { %s248_s13 = sshll.u32 %s237_s24, 4  ;;  %p1087_p11 = pneg %p1432_p3  ;;  %s249_s13 = int_to_ptr.vmem [resolvable:$true] %s248_s13 }
  0x59   : > { %s1090_s9 = scalar_lea.hbm %s1572_s1, 2688 }
  0x5b   : > { %s884_s12 = smul.u32 48, %s240_s19 }
  0x5d   : > { %s246_s4 = scalar_lea.hbm %s1572_s1, %s884_s12 }
  0x5e   : > { %s1085_s22 = scalar_lea.hbm %s246_s4, 48  ;;  %p1091_p12 = scmp.lt.s32.totalorder %s246_s4, %s1572_s1 }
  0x5f   : > { %p1086_p9 = scmp.ne.s32.totalorder %s246_s4, %s1085_s22  ;;  %p1092_p0 = scmp.lt.s32.totalorder %s1090_s9, %s1085_s22 }
  0x61   : > { %p1088_p10 = pnand %p1087_p11, %p1086_p9  ;;  %p1093_p5 = por %p1092_p0, %p1091_p12 }
  0x63   : > { %p1089_p6 = pneg %p1088_p10 }
  0x65   : > { %p1094_p4 = pnand %p1093_p5, %p1089_p6 }
  0x67   : > { %1097 = shalt.err (!%p1094_p4)
}
  0x68   : > { %s1098_s10 = scalar_lea.vmem %s249_s13, 48  ;;  %s1246_s20 = smov [#allocation5]  }
  0x69   : > { %p1099_p13 = scmp.ne.s32.totalorder %s249_s13, %s1098_s10  ;;  %s1103_s12 = sshll.u32 %s1246_s20, 4  ;;  %s1104_s12 = int_to_ptr.vmem [resolvable:$false] %s1103_s12 }
  0x6a   : > { %s1105_s21 = scalar_lea.vmem %s1104_s12, 96  ;;  %p1106_p9 = scmp.lt.s32.totalorder %s249_s13, %s1104_s12 }
  0x6b   : > { %p1101_p1 = pnand %p1099_p13, %p1087_p11  ;;  %p1107_p10 = scmp.lt.s32.totalorder %s1105_s21, %s1098_s10 }
  0x6d   : > { %p1102_p7 = pneg %p1101_p1  ;;  %p1108_p8 = por %p1107_p10, %p1106_p9 }
  0x6f   : > { %p1109_p2 = pnand %p1108_p8, %p1102_p7 }
  0x71   : > { %1112 = shalt.err (!%p1109_p2)
}
  0x72   : > { %912 = dma.hbm_to_vmem [thread:$0]  (!%p1432_p3), %s246_s4, 48, %s249_s13, %s234_s2  }
  0x73   : > { %p1613_p12 = scmp.ne.s32.totalorder %s1604_s18, 0 }
  0x74   : > { %s259_s25 = sand.u32 (!%p1613_p12), 1, %s1215_s29   ;;  %p1614_p11 = scmp.ne.s32.totalorder (!%p1613_p12), %s1599_s15, 0 }
  0x75   : > { %257 = sbr.rel (%p1613_p12) target bundleno = 617 (0x269), region = 40  ;;  %s260_s24 = scalar_lea.sflag (!%p1613_p12), [#allocation6], %s259_s25 }
  0x76   : > { %s885_s19 = smul.u32 (!%p1613_p12), 3, %s259_s25 }
  0x78   : > { %s263_s22 = scalar_lea.vmem (!%p1613_p12), [#allocation5], %s885_s19 }
  0x7a   : > { %1186 = dma.done.wait (%p1614_p11), %s260_s24, 48  }
  0x7b   : > { %1188 = vsyncadd (%p1614_p11), %s260_s24, 4294967248  ;;  %p1615_p8 = scmp.ne.s32.totalorder %s1598_s14, 0 }
  0x7d   : > { %1190 = dma.done.wait (%p1615_p8), [#allocation9], 8192  }
  0x7e   : > { %1192 = vsyncadd (%p1615_p8), [#allocation9], 4294959104  ;;  %s295_s4 = sand.u32 1, %s1203_s0   ;;  %p739_p2 = scmp.ne.s32.totalorder %s1223_s7, 0 }
  0x7f   : > { %s1466_s16 = scalar_lea.vmem [#allocation11], %s295_s4 }
  0x80   : > { %303 = sbr.rel (%p739_p2) target bundleno = 137 (0x89), region = 56 }
  0x85   : > { %v304_v0 = vlaneseq  ;;  %v1247_v1 = vmov 0.0  }
  0x87   : > { %vm306_vm0 = vcmp.lt.s32.totalorder %v304_v0, 384 }
  0x88   : > { %308 = vst.msk [vmem:[#allocation2] sm:$0x7] %vm306_vm0, %v1247_v1 }
  0x89 PF: > { %v310_v3 = vld [vmem:[%s263_s22] sm:$0x7]  ;;  %v312_v4 = vlaneseq  ;;  %p740_p3 = scmp.ne.s32.totalorder %s1223_s7, 7 }
  0x8b   : > { %vm314_vm1 = vcmp.lt.s32.totalorder %v312_v4, 384 }
  0x8e   : > { %320 = sbr.rel (%p740_p3) target bundleno = 591 (0x24f), region = 60 }
  0x8f   : > { %v309_v2 = vld [vmem:[#allocation2] sm:$0x7] }
  0x90   : > { %v311_v5 = vadd.f32 %v310_v3, %v309_v2 }
  0x92   : > { %316 = vst.msk [vmem:[#allocation2] sm:$0x7] %vm314_vm1, %v311_v5 }
  0x93   : > { %v354_v6 = vld [vmem:[#allocation8 + $0xf8] sm:$0xff]  ;;  %v353_v8 = vld [vmem:[#allocation8 + $0xf0] sm:$0xff]  ;;  %v1248_v10 = vmov 0.0   ;;  %v352_v11 = vld [vmem:[#allocation8 + $0xe8] sm:$0xff]  ;;  %vm1249_vm2 = vmmov 0   ;;  %v374_v36 = vshrl.u32 %v312_v4, 7 }
  0x94   : > { %v338_v7 = vld [vmem:[#allocation8 + $0x78] sm:$0xff]  ;;  %744 = vmatprep.subr.mxu0 %v354_v6  ;;  %v337_v9 = vld [vmem:[#allocation8 + $0x70] sm:$0xff]  ;;  %813 = vmatprep.subr.mxu1 %v1248_v10  ;;  %v336_v13 = vld [vmem:[#allocation8 + $0x68] sm:$0xff] }
  0x95   : > { %745 = vmatpush3.msra.mxu0 %v338_v7  ;;  %v370_v12 = vld [vmem:[#allocation8 + $0x178] sm:$0xff]  ;;  %845 = vmatprep.mubr.msk.f32.mxu1 %vm1249_vm2, %v1248_v10  ;;  %v369_v14 = vld [vmem:[#allocation8 + $0x170] sm:$0xff]  ;;  %v351_v15 = vld [vmem:[#allocation8 + $0xe0] sm:$0xff]  ;;  %v379_v45 = vsub.s32 1, %v374_v36  ;;  %v375_v53 = vsub.s32 0, %v374_v36  ;;  %v383_v57 = vsub.s32 2, %v374_v36 }
  0x96   : > { %746 = vmatprep.subr.mxu0 %v353_v8  ;;  %814 = vmatpush3.msra.mxu1 %v370_v12  ;;  %v368_v16 = vld [vmem:[#allocation8 + $0x168] sm:$0xff]  ;;  %v335_v17 = vld [vmem:[#allocation8 + $0x60] sm:$0xff]  ;;  %v350_v18 = vld [vmem:[#allocation8 + $0xd8] sm:$0xff] }
  0x97   : > { %747 = vmatpush3.msra.mxu0 %v337_v9  ;;  %815 = vmatprep.subr.mxu1 %v1248_v10  ;;  %v367_v19 = vld [vmem:[#allocation8 + $0x160] sm:$0xff]  ;;  %v334_v20 = vld [vmem:[#allocation8 + $0x58] sm:$0xff]  ;;  %v349_v21 = vld [vmem:[#allocation8 + $0xd0] sm:$0xff] }
  0x98   : > { %748 = vmatprep.subr.mxu0 %v352_v11  ;;  %816 = vmatpush3.msra.mxu1 %v369_v14  ;;  %v366_v22 = vld [vmem:[#allocation8 + $0x158] sm:$0xff]  ;;  %v333_v23 = vld [vmem:[#allocation8 + $0x50] sm:$0xff]  ;;  %v348_v24 = vld [vmem:[#allocation8 + $0xc8] sm:$0xff] }
  0x99   : > { %749 = vmatpush3.msra.mxu0 %v336_v13  ;;  %817 = vmatprep.subr.mxu1 %v1248_v10  ;;  %v365_v25 = vld [vmem:[#allocation8 + $0x150] sm:$0xff]  ;;  %v332_v26 = vld [vmem:[#allocation8 + $0x48] sm:$0xff]  ;;  %v347_v27 = vld [vmem:[#allocation8 + $0xc0] sm:$0xff] }
  0x9a   : > { %750 = vmatprep.subr.mxu0 %v351_v15  ;;  %818 = vmatpush3.msra.mxu1 %v368_v16  ;;  %v364_v28 = vld [vmem:[#allocation8 + $0x148] sm:$0xff]  ;;  %v331_v29 = vld [vmem:[#allocation8 + $0x40] sm:$0xff]  ;;  %v346_v30 = vld [vmem:[#allocation8 + $0xb8] sm:$0xff] }
  0x9b   : > { %751 = vmatpush3.msra.mxu0 %v335_v17  ;;  %819 = vmatprep.subr.mxu1 %v1248_v10  ;;  %v363_v31 = vld [vmem:[#allocation8 + $0x140] sm:$0xff]  ;;  %v330_v32 = vld [vmem:[#allocation8 + $0x38] sm:$0xff]  ;;  %v345_v33 = vld [vmem:[#allocation8 + $0xb0] sm:$0xff] }
  0x9c   : > { %752 = vmatprep.subr.mxu0 %v350_v18  ;;  %820 = vmatpush3.msra.mxu1 %v367_v19  ;;  %v362_v34 = vld [vmem:[#allocation8 + $0x138] sm:$0xff]  ;;  %v329_v35 = vld [vmem:[#allocation8 + $0x30] sm:$0xff]  ;;  %v344_v37 = vld [vmem:[#allocation8 + $0xa8] sm:$0xff] }
  0x9d   : > { %753 = vmatpush3.msra.mxu0 %v334_v20  ;;  %821 = vmatprep.subr.mxu1 %v1248_v10  ;;  %v361_v38 = vld [vmem:[#allocation8 + $0x130] sm:$0xff]  ;;  %v328_v40 = vld [vmem:[#allocation8 + $0x28] sm:$0xff]  ;;  %v343_v41 = vld [vmem:[#allocation8 + $0xa0] sm:$0xff] }
  0x9e   : > { %754 = vmatprep.subr.mxu0 %v349_v21  ;;  %822 = vmatpush3.msra.mxu1 %v366_v22  ;;  %v321_v39 = vld [vmem:[#allocation2] sm:$0x7]  ;;  %v360_v42 = vld [vmem:[#allocation8 + $0x128] sm:$0xff]  ;;  %v327_v43 = vld [vmem:[#allocation8 + $0x20] sm:$0xff] }
  0x9f   : > { %755 = vmatpush3.msra.mxu0 %v333_v23  ;;  %823 = vmatprep.subr.mxu1 %v1248_v10  ;;  %v322_v44 = vmul.f32 0.125, %v321_v39  ;;  %v342_v46 = vld [vmem:[#allocation8 + $0x98] sm:$0xff]  ;;  %v359_v47 = vld [vmem:[#allocation8 + $0x120] sm:$0xff]  ;;  %v341_v49 = vld [vmem:[#allocation8 + $0x90] sm:$0xff] }
  0xa0   : > { %756 = vmatprep.subr.mxu0 %v348_v24  ;;  %824 = vmatpush3.msra.mxu1 %v365_v25  ;;  %v326_v48 = vld [vmem:[#allocation8 + $0x18] sm:$0xff]  ;;  %v325_v51 = vld [vmem:[#allocation8 + $0x10] sm:$0xff]  ;;  %v340_v54 = vld [vmem:[#allocation8 + $0x88] sm:$0xff] }
  0xa1   : > { %757 = vmatpush3.msra.mxu0 %v332_v26  ;;  %825 = vmatprep.subr.mxu1 %v1248_v10  ;;  %v358_v50 = vld [vmem:[#allocation8 + $0x118] sm:$0xff]  ;;  %v380_v52 = vrot.slane %v322_v44, %v379_v45  ;;  %v324_v55 = vld [vmem:[#allocation8 + $0x8] sm:$0xff]  ;;  %v357_v56 = vld [vmem:[#allocation8 + $0x110] sm:$0xff]  ;;  %v376_v60 = vrot.slane %v322_v44, %v375_v53  ;;  %v384_v63 = vrot.slane %v322_v44, %v383_v57 }
  0xa2   : > { %758 = vmatprep.subr.mxu0 %v347_v27  ;;  %826 = vmatpush3.msra.mxu1 %v364_v28  ;;  %v339_v58 = vld [vmem:[#allocation8 + $0x80] sm:$0xff]  ;;  %v356_v61 = vld [vmem:[#allocation8 + $0x108] sm:$0xff]  ;;  %v544_v0 = vld [vmem:[#allocation10 + $0x78] sm:$0xff] }
  0xa3   : > { %759 = vmatpush3.msra.mxu0 %v331_v29  ;;  %827 = vmatprep.subr.mxu1 %v1248_v10  ;;  %v323_v59 = vld [vmem:[#allocation8] sm:$0xff]  ;;  %v543_v1 = vld [vmem:[#allocation10 + $0x70] sm:$0xff]  ;;  %v542_v2 = vld [vmem:[#allocation10 + $0x68] sm:$0xff] }
  0xa4   : > { %760 = vmatprep.subr.mxu0 %v346_v30  ;;  %828 = vmatpush3.msra.mxu1 %v363_v31  ;;  %v355_v62 = vld [vmem:[#allocation8 + $0x100] sm:$0xff]  ;;  %v540_v4 = vld [vmem:[#allocation10 + $0x58] sm:$0xff]  ;;  %v539_v5 = vld [vmem:[#allocation10 + $0x50] sm:$0xff] }
  0xa5   : > { %761 = vmatpush3.msra.mxu0 %v330_v32  ;;  %829 = vmatprep.subr.mxu1 %v1248_v10  ;;  %v541_v3 = vld [vmem:[#allocation10 + $0x60] sm:$0xff]  ;;  %v538_v6 = vld [vmem:[#allocation10 + $0x48] sm:$0xff]  ;;  %v536_v8 = vld [vmem:[#allocation10 + $0x38] sm:$0xff] }
  0xa6   : > { %762 = vmatprep.subr.mxu0 %v345_v33  ;;  %830 = vmatpush3.msra.mxu1 %v362_v34  ;;  %v537_v7 = vld [vmem:[#allocation10 + $0x40] sm:$0xff]  ;;  %v535_v9 = vld [vmem:[#allocation10 + $0x30] sm:$0xff]  ;;  %v534_v11 = vld [vmem:[#allocation10 + $0x28] sm:$0xff] }
  0xa7   : > { %763 = vmatpush3.msra.mxu0 %v329_v35  ;;  %831 = vmatprep.subr.mxu1 %v1248_v10  ;;  %v533_v12 = vld [vmem:[#allocation10 + $0x20] sm:$0xff]  ;;  %v532_v13 = vld [vmem:[#allocation10 + $0x18] sm:$0xff]  ;;  %v531_v14 = vld [vmem:[#allocation10 + $0x10] sm:$0xff] }
  0xa8   : > { %764 = vmatprep.subr.mxu0 %v344_v37  ;;  %832 = vmatpush3.msra.mxu1 %v361_v38  ;;  %v530_v15 = vld [vmem:[#allocation10 + $0x8] sm:$0xff]  ;;  %v529_v16 = vld [vmem:[#allocation10] sm:$0xff]  ;;  %v371_v19 = vld [vmem:[%s1574_s3] sm:$0x1] }
  0xa9   : > { %765 = vmatpush3.msra.mxu0 %v328_v40  ;;  %833 = vmatprep.subr.mxu1 %v1248_v10 }
  0xaa   : > { %766 = vmatprep.subr.mxu0 %v343_v41  ;;  %834 = vmatpush3.msra.mxu1 %v360_v42 }
  0xab   : > { %767 = vmatpush3.msra.mxu0 %v327_v43  ;;  %835 = vmatprep.subr.mxu1 %v1248_v10 }
  0xac   : > { %768 = vmatprep.subr.mxu0 %v342_v46  ;;  %836 = vmatpush3.msra.mxu1 %v359_v47 }
  0xad   : > { %769 = vmatpush3.msra.mxu0 %v326_v48  ;;  %837 = vmatprep.subr.mxu1 %v1248_v10 }
  0xae   : > { %770 = vmatprep.subr.mxu0 %v341_v49  ;;  %838 = vmatpush3.msra.mxu1 %v358_v50 }
  0xaf   : > { %771 = vmatpush3.msra.mxu0 %v325_v51  ;;  %839 = vmatprep.subr.mxu1 %v1248_v10 }
  0xb0   : > { %772 = vmatprep.subr.mxu0 %v340_v54  ;;  %452 = vmatprep.mubr.f32.mxu0 %v380_v52 }
  0xb1   : > { %773 = vmatpush3.msra.mxu0 %v324_v55  ;;  %840 = vmatpush3.msra.mxu1 %v357_v56 }
  0xb2   : > { %774 = vmatprep.subr.mxu0 %v339_v58  ;;  %841 = vmatprep.subr.mxu1 %v1248_v10 }
  0xb3   : > { %775 = vmatpush3.msra.mxu0 %v323_v59  ;;  %842 = vmatpush3.msra.mxu1 %v356_v61 }
  0xb4   : > { %453 = vmatmul.mubr.f32.vlgmr.msra.gmra.mxu0 %v376_v60  ;;  %843 = vmatprep.subr.mxu1 %v1248_v10 }
  0xb5   : > { %844 = vmatpush3.msra.mxu1 %v355_v62  ;;  %848 = vmatprep.subr.mxu0 %v1248_v10 }
  0xb6   : > { %846 = vmatmul.mubr.f32.vlgmr.msra.gmra.mxu1 %v384_v63  ;;  %849 = vmatpush3.msra.mxu0 %v544_v0 }
  0xb7   : > { %850 = vmatprep.subr.mxu0 %v1248_v10  ;;  %880 = vmatprep.mubr.msk.f32.mxu0 %vm1249_vm2, %v1248_v10 }
  0xb8   : > { %851 = vmatpush3.msra.mxu0 %v543_v1 }
  0xb9   : > { %852 = vmatprep.subr.mxu0 %v1248_v10 }
  0xba   : > { %853 = vmatpush3.msra.mxu0 %v542_v2 }
  0xbb   : > { %854 = vmatprep.subr.mxu0 %v1248_v10 }
  0xbc   : > { %855 = vmatpush3.msra.mxu0 %v541_v3 }
  0xbd   : > { %856 = vmatprep.subr.mxu0 %v1248_v10 }
  0xbe   : > { %857 = vmatpush3.msra.mxu0 %v540_v4 }
  0xbf   : > { %858 = vmatprep.subr.mxu0 %v1248_v10 }
  0xc0   : > { %859 = vmatpush3.msra.mxu0 %v539_v5 }
  0xc1   : > { %860 = vmatprep.subr.mxu0 %v1248_v10 }
  0xc2   : > { %861 = vmatpush3.msra.mxu0 %v538_v6 }
  0xc3   : > { %862 = vmatprep.subr.mxu0 %v1248_v10 }
  0xc4   : > { %863 = vmatpush3.msra.mxu0 %v537_v7 }
  0xc5   : > { %864 = vmatprep.subr.mxu0 %v1248_v10 }
  0xc6   : > { %865 = vmatpush3.msra.mxu0 %v536_v8 }
  0xc7   : > { %866 = vmatprep.subr.mxu0 %v1248_v10 }
  0xc8   : > { %867 = vmatpush3.msra.mxu0 %v535_v9 }
  0xc9   : > { %868 = vmatprep.subr.mxu0 %v1248_v10 }
  0xca   : > { %869 = vmatpush3.msra.mxu0 %v534_v11 }
  0xcb   : > { %870 = vmatprep.subr.mxu0 %v1248_v10 }
  0xcc   : > { %871 = vmatpush3.msra.mxu0 %v533_v12 }
  0xcd   : > { %872 = vmatprep.subr.mxu0 %v1248_v10 }
  0xce   : > { %873 = vmatpush3.msra.mxu0 %v532_v13 }
  0xcf   : > { %874 = vmatprep.subr.mxu0 %v1248_v10 }
  0xd0   : > { %875 = vmatpush3.msra.mxu0 %v531_v14 }
  0xd1   : > { %876 = vmatprep.subr.mxu0 %v1248_v10 }
  0xd2   : > { %877 = vmatpush3.msra.mxu0 %v530_v15 }
  0xd3   : > { %878 = vmatprep.subr.mxu0 %v1248_v10  ;;  %v545_v10 = vld [vmem:[%s1576_s5] sm:$0x1] }
  0xd4   : > { %879 = vmatpush3.msra.mxu0 %v529_v16 }
 0x174   : > { %v776_v17 = vpop.f32.mrf.mxu0 }
 0x176   : > { %v777_v18 = vpop.f32.mrf.mxu0  ;;  %v524_v20 = vpop.f32.mrf.mxu1 }
 0x177   : > { %v778_v21 = vadd.f32 %v777_v18, %v776_v17 }
 0x178   : > { %v847_v22 = vpop.f32.mrf.mxu1 }
 0x179   : > { %v455_v23 = vadd.f32 %v778_v21, %v371_v19 }
 0x17b   : > { %v525_v24 = vadd.f32 %v524_v20, %v455_v23 }
 0x17d   : > { %1019 = vtanh.f32 %v525_v24 }
 0x18a   : > { %v1020_v25 = vpop.eup %1019 }
 0x18b   : > { %881 = vmatmul.mubr.f32.vlgmr.msra.gmra.mxu0 %v1020_v25 }
 0x24b   : > { %v612_v26 = vpop.f32.mrf.mxu0 }
 0x24c   : > { %v613_v27 = vadd.f32 %v612_v26, %v545_v10 }
 0x24d   : > { %v882_v28 = vpop.f32.mrf.mxu0 }
 0x24e   : > { %616 = vst [vmem:[%s1466_s16] sm:$0x1] %v613_v27 }
 0x24f PF: > { %s1616_s13 = sld [smem:[#allocation21_spill]]  ;;  %s741_s2 = sshll.u32 %s1227_s8, 4 }
 0x250   : > { %s1617_s9 = sld [smem:[#allocation28_spill]]  ;;  %s630_s10 = sshll.u32 %s1466_s16, 4  ;;  %s631_s10 = int_to_ptr.vmem [resolvable:$true] %s630_s10 }
 0x251   : > { %s618_s20 = scalar_lea.sflag [#allocation7], %s295_s4  ;;  %s1113_s12 = scalar_lea.vmem %s631_s10, 16 }
 0x252   : > { %p1114_p6 = scmp.ne.s32.totalorder %s631_s10, %s1113_s12  ;;  %s1250_s21 = smov [#allocation11]  }
 0x253   : > { %s1117_s25 = sshll.u32 %s1250_s21, 4  ;;  %s1118_s25 = int_to_ptr.vmem [resolvable:$false] %s1117_s25 }
 0x254   : > { %s1119_s19 = scalar_lea.vmem %s1118_s25, 32  ;;  %p1120_p13 = scmp.lt.s32.totalorder %s631_s10, %s1118_s25 }
 0x255   : > { %p1619_p0 = scmp.ne.s32.totalorder %s1616_s13, 0  ;;  %p1121_p1 = scmp.lt.s32.totalorder %s1119_s19, %s1113_s12 }
 0x256   : > { %s1618_s17 = smov %s1617_s9  ;;  %s628_s26 = scalar_lea.hbm %s1617_s9, %s741_s2 }
 0x257   : > { %p1115_p5 = pnand %p1114_p6, %p1619_p0  ;;  %p1122_p7 = por %p1121_p1, %p1120_p13 }
 0x259   : > { %p1116_p4 = pneg %p1115_p5 }
 0x25b   : > { %p1123_p9 = pnand %p1122_p7, %p1116_p4 }
 0x25d   : > { %1126 = shalt.err (!%p1123_p9)
}
 0x25e   : > { %s1127_s8 = scalar_lea.hbm %s628_s26, 16  ;;  %s1131_s4 = scalar_lea.hbm %s1618_s17, 32 }
 0x25f   : > { %p1128_p10 = scmp.ne.s32.totalorder %s628_s26, %s1127_s8  ;;  %p1132_p8 = scmp.lt.s32.totalorder %s628_s26, %s1618_s17 }
 0x260   : > { %p1133_p2 = scmp.lt.s32.totalorder %s1131_s4, %s1127_s8 }
 0x261   : > { %p1129_p12 = pnand %p1128_p10, %p1619_p0 }
 0x262   : > { %p1134_p3 = por %p1133_p2, %p1132_p8 }
 0x263   : > { %p1130_p11 = pneg %p1129_p12 }
 0x265   : > { %p1135_p6 = pnand %p1134_p3, %p1130_p11 }
 0x267   : > { %1138 = shalt.err (!%p1135_p6)
}
 0x268   : > { %898 = dma.vmem_to_hbm [thread:$0]  (%p1619_p0), %s631_s10, 16, %s628_s26, %s618_s20  }
 0x269 PF: > { %s1620_s14 = sld [smem:[#allocation18_spill]]  ;;  %p922_p5 = scmp.ge.s32.totalorder %s1239_s11, 2 }
 0x26a   : > { %s1621_s15 = sld [smem:[#allocation22_spill]] }
 0x26f   : > { %s642_s18 = sand.u32 1, %s1620_s14  }
 0x270   : > { %p1622_p4 = scmp.ne.s32.totalorder %s1621_s15, 0  ;;  %s643_s2 = scalar_lea.sflag [#allocation7], %s642_s18 }
 0x272   : > { %p914_p13 = pnand %p922_p5, %p1622_p4 }
 0x274   : > { %p915_p1 = pneg %p914_p13 }
 0x276   : > { %1194 = dma.done.wait (%p915_p1), %s643_s2, 16  }
 0x277   : > { %1196 = vsyncadd (%p915_p1), %s643_s2, 4294967280  ;;  %s29_s11 = sadd.s32 1, %s1239_s11   ;;  %s1623_s6 = sld [smem:[#allocation25_spill]] }
 0x278   : > { %p26_p7 = scmp.ge.s32.totalorder %s29_s11, 18   ;;  %s1624_s13 = smov %s1437_s28 }
 0x279   : > { %s1625_s7 = sld [smem:[#allocation19_spill]]  ;;  %s1629_s26 = smov %s1203_s0 }
 0x27a   : > { %s1626_s8 = sld [smem:[#allocation20_spill]]  ;;  %s1630_s0 = smov %s1207_s27 }
 0x27b   : > { %s1627_s9 = sld [smem:[#allocation23_spill]]  ;;  %s1632_s28 = smov %s1215_s29 }
 0x27c   : > { %s1628_s10 = sld [smem:[#allocation24_spill]]  ;;  %s1633_s29 = smov %s1219_s30 }
 0x27d   : > { %s1631_s27 = smov %s1623_s6  ;;  %s1634_s30 = smov %s1624_s13 }
 0x27e   :  { %28 = sbr.rel (!%p26_p7) target bundleno = 26 (0x1a), region = 101 }
 0x283   :  { %647 = vsyncpa [#allocation6], 1 }
 0x284   :  { %649 = vsyncpa [#allocation6 + $0x1], 1 }
 0x285   :  { %650 = vsyncpa [#allocation9], 1 }
 0x286   :  { %651 = vsyncpa [#allocation7], 1 }
 0x287   :  { %653 = vsyncpa [#allocation7 + $0x1], 1 }

</bundles_post_ra>
